<compile_context>
chip_gen: v7x
topology: tpu7x:2x2x1
jax: 0.10.0
libtpu: 0.0.40
codegen_flags: <defaults>
</compile_context>

<pallas_src>
import jax
import jax.numpy as jnp
from jax.experimental import pallas as pl
from jax.experimental.pallas import tpu as pltpu


_LANE = 128
_SUB = 8
_TILE_BYTES_TARGET = 4 << 20   # ~4 MiB per input tile
_VMEM_LIMIT_BYTES = 32 << 20   # safe on v5e/v6e/v7x; >= 2x headroom over use


def _round_up(x, m):
    return (x + m - 1) // m * m


def _choose_fold(rows0, hw):
    """Pick k | hw for the metadata reshape (rows0, hw) -> (rows0*k, hw//k).

    Only lane-dense folds ((hw//k) % 128 == 0) are considered; among those we
    prefer a row count that is a multiple of the 8-sublane tile, then enough
    rows for pipelining / a megacore split, then the widest columns
    (smallest k). Falls back to k=1 if no lane-dense fold exists.
    """
    best_k, best_score = 1, None
    k = 1
    while k <= hw and k * rows0 <= 4096:
        if hw % k == 0 and (hw // k) % _LANE == 0:
            rows = rows0 * k
            score = (rows % _SUB == 0, rows >= 4 * _SUB, -k)
            if best_score is None or score > best_score:
                best_k, best_score = k, score
        k += 1
    return best_k


def _norm_kernel(img_ref, scale_ref, bias_ref, out_ref):
    # img/out: (TR, TCOL) lane-dense tile; scale/bias: (TR, 1) f32 per-row
    # constants (block stays resident across the column grid axis).
    x = img_ref[...].astype(jnp.float32)
    out_ref[...] = (x * scale_ref[...] + bias_ref[...]).astype(out_ref.dtype)


def normalization(img, mean, std):
    """(img - mean) / std with mean/std broadcast as (C, 1, 1) over NCHW img."""
    B, C, H, W = img.shape
    dtype = img.dtype
    itemsize = jnp.dtype(dtype).itemsize

    rows0 = B * C
    hw = H * W
    k = _choose_fold(rows0, hw)
    R = rows0 * k              # one row per (batch, channel, spatial chunk)
    N = hw // k                # lane dimension

    # ---- tile sizes (non-divisible grid; Pallas masks the edge blocks) ------
    tcol_cap = max(_LANE, (_TILE_BYTES_TARGET // (_SUB * itemsize)) // _LANE * _LANE)
    TCOL = min(_round_up(N, _LANE), tcol_cap)
    TR = max(_SUB, min(_round_up(R, _SUB),
                       (_TILE_BYTES_TARGET // (TCOL * itemsize)) // _SUB * _SUB))
    grid = (pl.cdiv(R, TR), pl.cdiv(N, TCOL))

    # ---- fold mean/std into per-row f32 scale/bias (one FMA per element) ----
    mean_f = jnp.asarray(mean, jnp.float32).reshape(C)
    std_f = jnp.asarray(std, jnp.float32).reshape(C)
    # row r = (b*C + c)*k + j  ->  channel = (r // k) % C
    scale = jnp.repeat(jnp.tile(1.0 / std_f, B), k).reshape(R, 1)
    bias = jnp.repeat(jnp.tile(-mean_f / std_f, B), k).reshape(R, 1)

    # Pure metadata reshape of the contiguous NCHW tensor: no extra HBM pass.
    flat = img.reshape(R, N)

    out_flat = pl.pallas_call(
        _norm_kernel,
        out_shape=jax.ShapeDtypeStruct((R, N), dtype),
        grid=grid,
        in_specs=[
            pl.BlockSpec((TR, TCOL), lambda i, j: (i, j)),
            pl.BlockSpec((TR, 1), lambda i, j: (i, 0)),
            pl.BlockSpec((TR, 1), lambda i, j: (i, 0)),
        ],
        out_specs=pl.BlockSpec((TR, TCOL), lambda i, j: (i, j)),
        compiler_params=pltpu.CompilerParams(
            dimension_semantics=("parallel", "parallel"),
            vmem_limit_bytes=_VMEM_LIMIT_BYTES,
        ),
        cost_estimate=pl.CostEstimate(
            flops=2 * R * N,
            transcendentals=0,
            bytes_accessed=2 * R * N * itemsize,
        ),
    )(flat, scale, bias)

    return out_flat.reshape(B, C, H, W)


if __name__ == "__main__":
    # Standard ImageNet / VGG normalization constants (what this module is fed
    # in style-transfer code).
    mean = jnp.array([0.485, 0.456, 0.406], dtype=jnp.float32)
    std = jnp.array([0.229, 0.224, 0.225], dtype=jnp.float32)

    B, C, H, W = 2, 3, 16, 16
    key = jax.random.PRNGKey(0)
    img = jax.random.uniform(key, (B, C, H, W), dtype=jnp.float32)

    out = jax.block_until_ready(normalization(img, mean, std))

    # Reference: plain JAX broadcasting, same semantics as the PyTorch module.
    ref = (img - mean.reshape(-1, 1, 1)) / std.reshape(-1, 1, 1)
    assert out.shape == img.shape and out.dtype == img.dtype
    # mul-by-reciprocal vs divide differs by a couple of ulp at most.
    assert jnp.allclose(out, ref, atol=1e-5, rtol=1e-5)

    print("KERNEL_OK")
</pallas_src>

<mosaic_0001>
module attributes {stable_mosaic.version = 11 : i64} {
  func.func @_norm_kernel(%arg0: i32, %arg1: i32, %arg2: memref<8x256xf32, #tpu.memory_space<vmem>>, %arg3: memref<8x1xf32, #tpu.memory_space<vmem>>, %arg4: memref<8x1xf32, #tpu.memory_space<vmem>>, %arg5: memref<8x256xf32, #tpu.memory_space<vmem>>) attributes {dimension_semantics = [#tpu.dimension_semantics<parallel>, #tpu.dimension_semantics<parallel>], iteration_bounds = array<i64: 1, 1>, scalar_prefetch = 0 : i64, scratch_operands = 0 : i64, tpu.core_type = #tpu.core_type<tc>, window_params = [{transform_indices = @transform_0, window_bounds = array<i64: 8, 256>}, {transform_indices = @transform_1, window_bounds = array<i64: 8, 1>}, {transform_indices = @transform_2, window_bounds = array<i64: 8, 1>}, {transform_indices = @transform_3, window_bounds = array<i64: 8, 256>}]} {
    %c0 = arith.constant 0 : index
    %c0_0 = arith.constant 0 : index
    %0 = vector.load %arg2[%c0, %c0_0] : memref<8x256xf32, #tpu.memory_space<vmem>>, vector<8x256xf32>
    %c0_1 = arith.constant 0 : index
    %c0_2 = arith.constant 0 : index
    %1 = vector.load %arg3[%c0_1, %c0_2] : memref<8x1xf32, #tpu.memory_space<vmem>>, vector<8x1xf32>
    %2 = vector.broadcast %1 : vector<8x1xf32> to vector<8x256xf32>
    %3 = arith.mulf %0, %2 : vector<8x256xf32>
    %c0_3 = arith.constant 0 : index
    %c0_4 = arith.constant 0 : index
    %4 = vector.load %arg4[%c0_3, %c0_4] : memref<8x1xf32, #tpu.memory_space<vmem>>, vector<8x1xf32>
    %5 = vector.broadcast %4 : vector<8x1xf32> to vector<8x256xf32>
    %6 = arith.addf %3, %5 : vector<8x256xf32>
    %c0_5 = arith.constant 0 : index
    %c0_6 = arith.constant 0 : index
    %7 = vector.load %arg5[%c0_5, %c0_6] : memref<8x256xf32, #tpu.memory_space<vmem>>, vector<8x256xf32>
    tpu.vector_store %arg5[%c0_5, %c0_6], %6 {strides = array<i32>} : memref<8x256xf32, #tpu.memory_space<vmem>>, vector<8x256xf32>,
    return
  }
  func.func @transform_0(%arg0: i32, %arg1: i32) -> (i32, i32) {
    %c0_i32 = arith.constant 0 : i32
    return %arg0, %arg1 : i32, i32
  }
  func.func @transform_1(%arg0: i32, %arg1: i32) -> (i32, i32) {
    %c0_i32 = arith.constant 0 : i32
    %c0_i32_0 = arith.constant 0 : i32
    return %arg0, %c0_i32 : i32, i32
  }
  func.func @transform_2(%arg0: i32, %arg1: i32) -> (i32, i32) {
    %c0_i32 = arith.constant 0 : i32
    %c0_i32_0 = arith.constant 0 : i32
    return %arg0, %c0_i32 : i32, i32
  }
  func.func @transform_3(%arg0: i32, %arg1: i32) -> (i32, i32) {
    %c0_i32 = arith.constant 0 : i32
    return %arg0, %arg1 : i32, i32
  }
}

</mosaic_0001>

<bundles_post_ra>
// kernel: tpu_custom_call.1
= control target key start
LH: loop header
LB: loop body
LE: loop exit
PB: predicated region body
PF: predicated region fallthrough
CT: control target
= control target key end

     0   :  { %s122_s0 = inlined_call_operand.vmem [shape: f32[6,256], index: 0, kind: input, shape index: {}]   ;;  %s123_s1 = inlined_call_operand.vmem [shape: f32[6,1], index: 1, kind: input, shape index: {}]   ;;  %s124_s2 = inlined_call_operand.vmem [shape: f32[6,1], index: 2, kind: input, shape index: {}]   ;;  %s125_s3 = inlined_call_operand.hbm [shape: f32[6,256], index: 3, kind: output, shape index: {}]  }
   0x1   :  { %v17_v0 = vld [vmem:[%s123_s1] sm:$0xff] }
   0x2   :  { %8 = vsyncpa [#allocation3], 0  ;;  %v76_v1 = vmov 0   ;;  %v25_v2 = vld [vmem:[%s124_s2] sm:$0xff]  ;;  %v16_v5 = vld [vmem:[%s122_s0 + $0x8] sm:$0xff]  ;;  %s77_s20 = smov [#allocation2]  }
   0x3   :  { %51 = vset.pattern.permute.xlu0 %v76_v1  ;;  %v15_v4 = vld [vmem:[%s122_s0] sm:$0xff]  ;;  %s41_s1 = sshll.u32 %s77_s20, 4  ;;  %s42_s1 = int_to_ptr.vmem [resolvable:$true] %s41_s1 }
   0x4   :  { %20 = vperm.xlu0 %51, %v17_v0   ;;  %s52_s2 = scalar_lea.vmem %s42_s1, 256  ;;  %p57_p1 = scmp.lt.s32.totalorder %s42_s1, %s42_s1 }
   0x5   :  { %p53_p0 = scmp.ne.s32.totalorder %s42_s1, %s52_s2  ;;  %p58_p2 = scmp.lt.s32.totalorder %s52_s2, %s52_s2 }
   0x7   :  { %p59_p3 = por %p58_p2, %p57_p1 }
   0x8   :  { %28 = vperm.xlu0 %51, %v25_v2  }
   0x9   :  { %p60_p4 = pnand %p59_p3, %p53_p0 }
  0x83   :  { %v21_v3 = vpop.permute.xlu0 %20 }
  0x84   :  { %v23_v6 = vmul.f32 %v21_v3, %v15_v4  ;;  %v24_v7 = vmul.f32 %v21_v3, %v16_v5 }
  0x87   :  { %v29_v8 = vpop.permute.xlu0 %28 }
  0x88   :  { %v31_v9 = vadd.f32 %v29_v8, %v23_v6  ;;  %v32_v10 = vadd.f32 %v29_v8, %v24_v7 }
  0x8a   :  { %33 = vst [vmem:[#allocation2] sm:$0xff] %v31_v9  ;;  %34 = vst [vmem:[#allocation2 + $0x8] sm:$0xff] %v32_v10 }
  0x8b   :  { %63 = shalt.err (!%p60_p4)
}
  0x8c   :  { %s64_s0 = scalar_lea.hbm %s125_s3, 256 }
  0x8d   :  { %p65_p5 = scmp.ne.s32.totalorder %s125_s3, %s64_s0  ;;  %p68_p6 = scmp.lt.u32.totalorder %s64_s0, %s125_s3 }
  0x8f   :  { %p70_p7 = pnand %p68_p6, %p65_p5 }
  0x91   :  { %73 = shalt.err (!%p70_p7)
}
  0x92   :  { %44 = dma.vmem_to_hbm [thread:$0]  %s42_s1, 256, %s125_s3, [#allocation3]  }
  0x93   :  { %74 = dma.done.wait [#allocation3], 256  }
  0x94   :  { %75 = vsyncadd [#allocation3], 4294967040 }
  0x95   :  { %48 = vsyncpa [#allocation3], 1 }

</bundles_post_ra>
